<compile_context>
chip_gen: v7x
topology: tpu7x:2x2x1
jax: 0.10.0
libtpu: 0.0.40
codegen_flags: <defaults>
</compile_context>

<pallas_src>
import jax
import jax.numpy as jnp
from jax.experimental import pallas as pl
from jax.experimental.pallas import tpu as pltpu


_LANES = 512             # lane-dense last dim (multiple of 128 -> unmasked vst)
_MAX_BLOCK_ROWS = 512    # 512 x 512 x 4B = 1 MiB per stream per grid step
_SINGLE_BLOCK_ROWS = 16  # at/below this, one full-array block is cheapest


def _cdiv(a, b):
    return (a + b - 1) // b


def _round_up(a, b):
    return _cdiv(a, b) * b


def _affine_kernel(p_ref, x_ref, y_ref, z_ref, o_ref):
    """Folded affine map, VPU only (no MXU for a 3-wide contraction).

    p_ref (SMEM via scalar prefetch): p[0:3] = w_eff = w1 @ w2, p[3] = b_eff.
    x/y/z/o refs: (block_rows, _LANES) f32 tiles, batch laid out lane-dense.
    """
    o_ref[...] = (x_ref[...] * p_ref[0]
                  + y_ref[...] * p_ref[1]
                  + z_ref[...] * p_ref[2]
                  + p_ref[3])


def simple_model_forward(x, y, z, w1, b1, w2, b2):
    """Pallas implementation of SimpleModel.forward.

    x, y, z: (B, 1) float32
    w1: (3, 3) in (in, out) layout; b1: (3,)
    w2: (3, 1) in (in, out) layout; b2: (1,)
    returns: (B, 1) float32
    """
    B = x.shape[0]

    # Fold the two activation-free Linears into a single affine map.
    w1f = w1.astype(jnp.float32)
    w2f = w2.astype(jnp.float32)
    w_eff = (w1f @ w2f).reshape(3)                                   # (3,)
    b_eff = (b1.astype(jnp.float32) @ w2f).reshape(1) + b2.astype(jnp.float32).reshape(1)
    params = jnp.concatenate([w_eff, b_eff])                         # (4,) f32 -> SMEM

    # --- batch tiling: lane-dense (rows, 512) with minimal padding ---------
    rows_min = _cdiv(B, _LANES)
    if rows_min <= _SINGLE_BLOCK_ROWS:
        # Tiny batch: a single block equal to the full (lane-padded) array
        # (block == full dims, so the (8,128) rule is satisfied even if
        #  rows_min is not a multiple of 8).
        n_blocks, block_rows = 1, rows_min
    else:
        # >= 2 (even) grid steps so v7x's two TensorCores both issue DMAs;
        # blocks capped at 1 MiB/stream so depth-2 buffering fits every VMEM.
        n_blocks = max(2, _cdiv(rows_min, _MAX_BLOCK_ROWS))
        n_blocks += n_blocks % 2
        block_rows = _round_up(_cdiv(rows_min, n_blocks), 8)
    rows = n_blocks * block_rows
    Bp = rows * _LANES

    def _prep(a):
        a = a.reshape(-1).astype(jnp.float32)
        if Bp != B:
            a = jnp.pad(a, (0, Bp - B))   # at most a few padded rows
        return a.reshape(rows, _LANES)

    xr, yr, zr = _prep(x), _prep(y), _prep(z)

    spec = pl.BlockSpec((block_rows, _LANES), lambda i, p: (i, 0))

    out = pl.pallas_call(
        _affine_kernel,
        out_shape=jax.ShapeDtypeStruct((rows, _LANES), jnp.float32),
        grid_spec=pltpu.PrefetchScalarGridSpec(
            num_scalar_prefetch=1,
            grid=(n_blocks,),
            in_specs=[spec, spec, spec],
            out_specs=spec,
        ),
        compiler_params=pltpu.CompilerParams(
            dimension_semantics=("parallel",),  # independent batch tiles
        ),
        cost_estimate=pl.CostEstimate(
            flops=7 * Bp, transcendentals=0, bytes_accessed=16 * Bp),
    )(params, xr, yr, zr)

    if Bp == B:
        return out.reshape(B, 1)            # pure reshape, no slice copy
    return out.reshape(-1)[:B].reshape(B, 1)


def init_params(key):
    """Deterministic init mimicking nn.Linear's uniform(-1/sqrt(fan_in), ...)."""
    k1, k2, k3, k4 = jax.random.split(key, 4)
    bound1 = 1.0 / jnp.sqrt(3.0)  # linear1: in_features = 3
    w1 = jax.random.uniform(k1, (3, 3), jnp.float32, -bound1, bound1)  # (in, out)
    b1 = jax.random.uniform(k2, (3,), jnp.float32, -bound1, bound1)
    bound2 = 1.0 / jnp.sqrt(3.0)  # linear2: in_features = 3
    w2 = jax.random.uniform(k3, (3, 1), jnp.float32, -bound2, bound2)  # (in, out)
    b2 = jax.random.uniform(k4, (1,), jnp.float32, -bound2, bound2)
    return w1, b1, w2, b2


if __name__ == "__main__":
    key = jax.random.PRNGKey(0)
    kx, ky, kz, kp = jax.random.split(key, 4)
    w1, b1, w2, b2 = init_params(kp)

    fwd = jax.jit(simple_model_forward)

    # Small shapes: exercise (a) single-block + minimal lane padding and
    # (b) the even 2-block, no-pad pipelined path.
    for B in (1000, 16384):
        x = jax.random.normal(kx, (B, 1), jnp.float32)
        y = jax.random.normal(ky, (B, 1), jnp.float32)
        z = jax.random.normal(kz, (B, 1), jnp.float32)

        out = fwd(x, y, z, w1, b1, w2, b2)
        jax.block_until_ready(out)

        # Pure-JAX reference with the same semantics as the PyTorch module.
        ref = (jnp.concatenate((x, y, z), axis=1) @ w1 + b1) @ w2 + b2
        assert out.shape == (B, 1)
        assert jnp.allclose(out, ref, atol=1e-5, rtol=1e-5), f"mismatch at B={B}"

    print("KERNEL_OK")
</pallas_src>

<mosaic_0001>
module attributes {stable_mosaic.version = 11 : i64} {
  func.func @_affine_kernel(%arg0: i32, %arg1: memref<4xf32, #tpu.memory_space<smem>>, %arg2: memref<2x512xf32, #tpu.memory_space<vmem>>, %arg3: memref<2x512xf32, #tpu.memory_space<vmem>>, %arg4: memref<2x512xf32, #tpu.memory_space<vmem>>, %arg5: memref<2x512xf32, #tpu.memory_space<vmem>>) attributes {dimension_semantics = [#tpu.dimension_semantics<parallel>], iteration_bounds = array<i64: 1>, scalar_prefetch = 1 : i64, scratch_operands = 0 : i64, tpu.core_type = #tpu.core_type<tc>, window_params = [{transform_indices = @transform_0, window_bounds = array<i64: 2, 512>}, {transform_indices = @transform_1, window_bounds = array<i64: 2, 512>}, {transform_indices = @transform_2, window_bounds = array<i64: 2, 512>}, {transform_indices = @transform_3, window_bounds = array<i64: 2, 512>}]} {
    %c0 = arith.constant 0 : index
    %c0_0 = arith.constant 0 : index
    %0 = vector.load %arg2[%c0, %c0_0] : memref<2x512xf32, #tpu.memory_space<vmem>>, vector<2x512xf32>
    %c0_1 = arith.constant 0 : index
    %1 = memref.load %arg1[%c0_1] : memref<4xf32, #tpu.memory_space<smem>>
    %2 = vector.broadcast %1 : f32 to vector<2x512xf32>
    %3 = arith.mulf %0, %2 : vector<2x512xf32>
    %c0_2 = arith.constant 0 : index
    %c0_3 = arith.constant 0 : index
    %4 = vector.load %arg3[%c0_2, %c0_3] : memref<2x512xf32, #tpu.memory_space<vmem>>, vector<2x512xf32>
    %c1 = arith.constant 1 : index
    %5 = memref.load %arg1[%c1] : memref<4xf32, #tpu.memory_space<smem>>
    %6 = vector.broadcast %5 : f32 to vector<2x512xf32>
    %7 = arith.mulf %4, %6 : vector<2x512xf32>
    %8 = arith.addf %3, %7 : vector<2x512xf32>
    %c0_4 = arith.constant 0 : index
    %c0_5 = arith.constant 0 : index
    %9 = vector.load %arg4[%c0_4, %c0_5] : memref<2x512xf32, #tpu.memory_space<vmem>>, vector<2x512xf32>
    %c2 = arith.constant 2 : index
    %10 = memref.load %arg1[%c2] : memref<4xf32, #tpu.memory_space<smem>>
    %11 = vector.broadcast %10 : f32 to vector<2x512xf32>
    %12 = arith.mulf %9, %11 : vector<2x512xf32>
    %13 = arith.addf %8, %12 : vector<2x512xf32>
    %c3 = arith.constant 3 : index
    %14 = memref.load %arg1[%c3] : memref<4xf32, #tpu.memory_space<smem>>
    %15 = vector.broadcast %14 : f32 to vector<2x512xf32>
    %16 = arith.addf %13, %15 : vector<2x512xf32>
    %c0_6 = arith.constant 0 : index
    %c0_7 = arith.constant 0 : index
    %17 = vector.load %arg5[%c0_6, %c0_7] : memref<2x512xf32, #tpu.memory_space<vmem>>, vector<2x512xf32>
    tpu.vector_store %arg5[%c0_6, %c0_7], %16 {strides = array<i32>} : memref<2x512xf32, #tpu.memory_space<vmem>>, vector<2x512xf32>,
    return
  }
  func.func @transform_0(%arg0: i32, %arg1: memref<4xf32, #tpu.memory_space<smem>>) -> (i32, i32) {
    %c0_i32 = arith.constant 0 : i32
    %c0_i32_0 = arith.constant 0 : i32
    return %arg0, %c0_i32 : i32, i32
  }
  func.func @transform_1(%arg0: i32, %arg1: memref<4xf32, #tpu.memory_space<smem>>) -> (i32, i32) {
    %c0_i32 = arith.constant 0 : i32
    %c0_i32_0 = arith.constant 0 : i32
    return %arg0, %c0_i32 : i32, i32
  }
  func.func @transform_2(%arg0: i32, %arg1: memref<4xf32, #tpu.memory_space<smem>>) -> (i32, i32) {
    %c0_i32 = arith.constant 0 : i32
    %c0_i32_0 = arith.constant 0 : i32
    return %arg0, %c0_i32 : i32, i32
  }
  func.func @transform_3(%arg0: i32, %arg1: memref<4xf32, #tpu.memory_space<smem>>) -> (i32, i32) {
    %c0_i32 = arith.constant 0 : i32
    %c0_i32_0 = arith.constant 0 : i32
    return %arg0, %c0_i32 : i32, i32
  }
}

</mosaic_0001>

<bundles_post_ra>
// kernel: simple_model_forward.1
= control target key start
LH: loop header
LB: loop body
LE: loop exit
PB: predicated region body
PF: predicated region fallthrough
CT: control target
= control target key end

     0   :  { %s102_s0 = inlined_call_operand.vmem [shape: f32[4], index: 0, kind: input, shape index: {}]   ;;  %s103_s1 = inlined_call_operand.vmem [shape: f32[2,512], index: 1, kind: input, shape index: {}]   ;;  %s104_s2 = inlined_call_operand.vmem [shape: f32[2,512], index: 2, kind: input, shape index: {}]   ;;  %s105_s3 = inlined_call_operand.vmem [shape: f32[2,512], index: 3, kind: input, shape index: {}]   ;;  %s106_s4 = inlined_call_operand.vmem [shape: f32[2,512], index: 4, kind: output, shape index: {}]  }
   0x1   :  { %s9_s17 = sshll.u32 %s102_s0, 4  ;;  %s10_s17 = int_to_ptr.vmem [resolvable:$true] %s9_s17 }
   0x2   :  { %s47_s18 = scalar_lea.vmem %s10_s17, 16  ;;  %p52_p1 = scmp.lt.s32.totalorder %s10_s17, %s10_s17 }
   0x3   :  { %p48_p0 = scmp.ne.s32.totalorder %s10_s17, %s47_s18  ;;  %p53_p2 = scmp.lt.s32.totalorder %s47_s18, %s47_s18 }
   0x5   :  { %p54_p3 = por %p53_p2, %p52_p1 }
   0x7   :  { %p55_p4 = pnand %p54_p3, %p48_p0 }
   0x9   :  { %58 = shalt.err (!%p55_p4)  }
   0xa   :  { %s61_s19 = smov [#allocation3]  }
   0xb   :  { %12 = dma.vmem_to_smem %s10_s17, 16, %s61_s19, [#allocation2] }
   0xc   :  { %59 = dma.done.wait [#allocation2], 16 }
   0xd   :  { %60 = vsyncadd [#allocation2], 4294967280 }
   0xe   :  { %14 = sfence }
   0xf   :  { %s22_s20 = sld [smem:[#allocation3]]  ;;  %s43_s21 = sld [smem:[#allocation3 + $0x1]]  ;;  %v21_v0 = vld [vmem:[%s103_s1] sm:$0xff] }
  0x10   :  { %s44_s22 = sld [smem:[#allocation3 + $0x2]]  ;;  %s45_s23 = sld [smem:[#allocation3 + $0x3]]  ;;  %v25_v1 = vld [vmem:[%s104_s2] sm:$0xff] }
  0x11   :  { %v30_v2 = vld [vmem:[%s105_s3] sm:$0xff] }
  0x15   :  { %v23_v3 = vstv %s22_s20  ;;  %v27_v4 = vstv %s43_s21 }
  0x16   :  { %v24_v5 = vmul.f32 %v23_v3, %v21_v0  ;;  %v28_v6 = vmul.f32 %v27_v4, %v25_v1  ;;  %v32_v7 = vstv %s44_s22  ;;  %v36_v10 = vstv %s45_s23 }
  0x17   :  { %v33_v8 = vmul.f32 %v32_v7, %v30_v2 }
  0x18   :  { %v29_v9 = vadd.f32 %v28_v6, %v24_v5 }
  0x1a   :  { %v34_v11 = vadd.f32 %v33_v8, %v29_v9 }
  0x1c   :  { %v37_v12 = vadd.f32 %v36_v10, %v34_v11 }
  0x1e   :  { %38 = vst [vmem:[%s106_s4] sm:$0xff] %v37_v12 }

</bundles_post_ra>
